<compile_context>
chip_gen: v7x
topology: tpu7x:2x2x1
jax: 0.10.0
libtpu: 0.0.40
codegen_flags: <defaults>
</compile_context>

<pallas_src>
import functools

import jax
import jax.numpy as jnp
from jax.experimental import pallas as pl
from jax.experimental.pallas import tpu as pltpu


def _logreg_kernel(x_ref, y_ref, theta_ref, out_ref, *,
                   mu, inv_n_data, n_valid, tm, need_mask):
    """One (worker-group, data-tile) grid step.

    x_ref:     [WB, TM, dim]  natural [workers, rows, features] layout
    y_ref:     [WB, 1, TM]    lane-dense labels in {-1, +1}
    theta_ref: [WB, 1, dim]
    out_ref:   [WB, 1, 1]     per-worker accumulator, resident across the k axis
    """
    k = pl.program_id(1)
    last_k = pl.num_programs(1) - 1

    @pl.when(k == 0)
    def _init():
        out_ref[...] = jnp.zeros_like(out_ref)

    x = x_ref[...]                       # [WB, TM, dim]
    th = theta_ref[...]                  # [WB, 1, dim]
    y = y_ref[...][:, 0, :]              # [WB, TM]

    # scores_j = <x_j, theta_i>: VPU multiply + reduce over the feature axis
    # (dim = 32 << 128, so this intentionally skips the MXU).
    scores = jnp.sum(x * th, axis=2)     # [WB, TM]

    # Numerically stable softplus: log(1 + exp(z)) = max(z, 0) + log(1 + exp(-|z|)).
    z = -y * scores
    loss = jnp.maximum(z, 0.0) + jnp.log(1.0 + jnp.exp(-jnp.abs(z)))

    def _accumulate(vals):               # vals: [WB, TM]
        out_ref[...] += jnp.sum(vals, axis=1, keepdims=True)[..., None]

    if need_mask:
        # Only the last data tile contains out-of-range rows; keep the mask off
        # the hot path.  Use where/select (not multiply): the padded tail of the
        # tile is undefined and may contain non-finite garbage.
        @pl.when(k != last_k)
        def _full_tile():
            _accumulate(loss)

        @pl.when(k == last_k)
        def _ragged_tile():
            lane = jax.lax.broadcasted_iota(jnp.int32, loss.shape, 1)
            valid = (k * tm + lane) < n_valid
            _accumulate(jnp.where(valid, loss, 0.0))
    else:
        _accumulate(loss)

    @pl.when(k == last_k)
    def _finalize():
        reg = (0.5 * mu) * jnp.sum(th * th, axis=2, keepdims=True)   # [WB, 1, 1]
        out_ref[...] = out_ref[...] * inv_n_data + reg


def logistic_regression_forward(X, y, theta, *, mu, n_data=None, max_tm=None):
    """Decentralized l2-regularized logistic-regression loss, one scalar per worker.

    X: [n_workers, m, dim], y: [n_workers, m, 1] (labels in {-1,+1}),
    theta: [n_workers, dim, 1]  ->  out: [n_workers, 1]
    """
    n_workers, m, dim = X.shape
    if n_data is None:
        n_data = m

    # Natural layouts only: no materialized transpose, no big HBM pads.
    xf = X.astype(jnp.float32)                                         # [W, m, dim]
    yf = jnp.reshape(y, (n_workers, 1, m)).astype(jnp.float32)         # [W, 1, m] (free)
    tf = jnp.reshape(theta, (n_workers, 1, dim)).astype(jnp.float32)   # [W, 1, dim] (free)

    # Worker batching: keep >= 2 blocks on the leading "parallel" axis so both
    # v7x TensorCores get work (harmless on single-TC v5e/v6e).
    wb = min(8, pl.cdiv(n_workers, 2)) if n_workers >= 2 else 1
    wpad = pl.cdiv(n_workers, wb) * wb
    if wpad != n_workers:
        # Only the tiny theta array is padded; X / y use ragged trailing blocks
        # (garbage rows only affect padded workers, which are sliced off below).
        tf = jnp.pad(tf, ((0, wpad - n_workers), (0, 0), (0, 0)))

    # Data-tile size: biggest tile whose double-buffered X window fits the VMEM
    # budget, assuming the minor dim (dim << 128) is lane-padded to 128 in VMEM.
    lane_pad = pl.cdiv(dim, 128) * 128
    kind = ""
    try:
        kind = jax.devices()[0].device_kind.lower()
    except Exception:
        pass
    if ("v5" in kind) or ("v6" in kind):        # 128 MiB physical VMEM
        x_window_budget = 48 * 1024 * 1024      # double-buffered X window
        vmem_limit = 96 * 1024 * 1024
    else:                                       # v7x (64 MiB per TC) or unknown
        x_window_budget = 24 * 1024 * 1024
        vmem_limit = 48 * 1024 * 1024

    tm_cap = x_window_budget // (2 * wb * lane_pad * 4)
    tm_cap = max(128, (tm_cap // 128) * 128)
    if max_tm is not None:
        tm_cap = max(128, min(tm_cap, (max_tm // 128) * 128))
    if m <= tm_cap:
        tm, need_mask = m, False
    else:
        tm, need_mask = tm_cap, (m % tm_cap) != 0
    grid = (wpad // wb, pl.cdiv(m, tm))

    kernel = functools.partial(
        _logreg_kernel,
        mu=float(mu),
        inv_n_data=1.0 / float(n_data),
        n_valid=int(m),
        tm=int(tm),
        need_mask=bool(need_mask),
    )

    out = pl.pallas_call(
        kernel,
        out_shape=jax.ShapeDtypeStruct((wpad, 1, 1), jnp.float32),
        grid_spec=pltpu.PrefetchScalarGridSpec(
            num_scalar_prefetch=0,
            grid=grid,
            in_specs=[
                pl.BlockSpec((wb, tm, dim), lambda w, k: (w, k, 0)),   # X tile
                pl.BlockSpec((wb, 1, tm), lambda w, k: (w, 0, k)),     # y tile
                pl.BlockSpec((wb, 1, dim), lambda w, k: (w, 0, 0)),    # theta
            ],
            out_specs=pl.BlockSpec((wb, 1, 1), lambda w, k: (w, 0, 0)),  # accumulator
        ),
        compiler_params=pltpu.CompilerParams(
            dimension_semantics=("parallel", "arbitrary"),
            vmem_limit_bytes=vmem_limit,
        ),
    )(xf, yf, tf)

    return out[:n_workers, :, 0]   # [n_workers, 1]


def _reference(X, y, theta, mu, n_data):
    # Pure-JAX reference mirroring the PyTorch forward exactly.
    out = jnp.einsum("wmd,wdo->wmo", X, theta)
    out = -1.0 * y * out
    out = jnp.log(1.0 + jnp.exp(out))
    out = jnp.sum(out, axis=1) / n_data
    out = out + mu / 2.0 * jnp.sum(theta ** 2, axis=1)
    return out


if __name__ == "__main__":
    mu = 0.1
    key = jax.random.PRNGKey(0)

    def _make(k, W, m, dim):
        kx, ky, kt = jax.random.split(k, 3)
        X = jax.random.normal(kx, (W, m, dim), dtype=jnp.float32)
        y = jnp.where(jax.random.bernoulli(ky, 0.5, (W, m, 1)),
                      1.0, -1.0).astype(jnp.float32)
        theta = jax.random.normal(kt, (W, dim, 1), dtype=jnp.float32)
        return X, y, theta

    k1, k2, k3 = jax.random.split(key, 3)

    # 1) Small config matching the module's toy sizes (single data tile).
    X, y, theta = _make(k1, 4, 8, 32)
    out = jax.block_until_ready(
        logistic_regression_forward(X, y, theta, mu=mu, n_data=8))
    ref = _reference(X, y, theta, mu, 8)
    assert out.shape == (4, 1), out.shape
    assert jnp.allclose(out, ref, rtol=1e-4, atol=1e-4), (out, ref)

    # 2) Forced small tiles: exercises the k-grid and the masked ragged last tile.
    X2, y2, theta2 = _make(k2, 4, 1000, 32)
    out2 = jax.block_until_ready(
        logistic_regression_forward(X2, y2, theta2, mu=mu, n_data=1000, max_tm=256))
    ref2 = _reference(X2, y2, theta2, mu, 1000)
    assert out2.shape == (4, 1), out2.shape
    assert jnp.allclose(out2, ref2, rtol=1e-4, atol=1e-4), (out2, ref2)

    # 3) Ragged worker count: exercises partial leading blocks (no HBM pad of X/y).
    X3, y3, theta3 = _make(k3, 3, 100, 32)
    out3 = jax.block_until_ready(
        logistic_regression_forward(X3, y3, theta3, mu=mu, n_data=100))
    ref3 = _reference(X3, y3, theta3, mu, 100)
    assert out3.shape == (3, 1), out3.shape
    assert jnp.allclose(out3, ref3, rtol=1e-4, atol=1e-4), (out3, ref3)

    print("KERNEL_OK")
</pallas_src>

<mosaic_0001>
module attributes {stable_mosaic.version = 11 : i64} {
  func.func @_logreg_kernel(%arg0: i32, %arg1: i32, %arg2: memref<2x8x32xf32, #tpu.memory_space<vmem>>, %arg3: memref<2x1x8xf32, #tpu.memory_space<vmem>>, %arg4: memref<2x1x32xf32, #tpu.memory_space<vmem>>, %arg5: memref<2x1x1xf32, #tpu.memory_space<vmem>>) attributes {dimension_semantics = [#tpu.dimension_semantics<parallel>, #tpu.dimension_semantics<arbitrary>], iteration_bounds = array<i64: 2, 1>, scalar_prefetch = 0 : i64, scratch_operands = 0 : i64, tpu.core_type = #tpu.core_type<tc>, window_params = [{transform_indices = @transform_0, window_bounds = array<i64: 2, 8, 32>}, {transform_indices = @transform_1, window_bounds = array<i64: 2, 1, 8>}, {transform_indices = @transform_2, window_bounds = array<i64: 2, 1, 32>}, {transform_indices = @transform_3, window_bounds = array<i64: 2, 1, 1>}]} {
    %c0_i32 = arith.constant 0 : i32
    %0 = arith.cmpi eq, %arg1, %c0_i32 : i32
    %1 = arith.extui %0 : i1 to i32
    %c0_i32_0 = arith.constant 0 : i32
    %2 = arith.cmpi ne, %1, %c0_i32_0 : i32
    scf.if %2 {
      %cst_22 = arith.constant 0.000000e+00 : f32
      %32 = vector.broadcast %cst_22 : f32 to vector<2x1x1xf32>
      %c0_23 = arith.constant 0 : index
      %c0_24 = arith.constant 0 : index
      %c0_25 = arith.constant 0 : index
      %33 = vector.load %arg5[%c0_23, %c0_24, %c0_25] : memref<2x1x1xf32, #tpu.memory_space<vmem>>, vector<2x1x1xf32>
      tpu.vector_store %arg5[%c0_23, %c0_24, %c0_25], %32 {strides = array<i32>} : memref<2x1x1xf32, #tpu.memory_space<vmem>>, vector<2x1x1xf32>,
    } else {
    }
    %c0 = arith.constant 0 : index
    %c0_1 = arith.constant 0 : index
    %c0_2 = arith.constant 0 : index
    %3 = vector.load %arg2[%c0, %c0_1, %c0_2] : memref<2x8x32xf32, #tpu.memory_space<vmem>>, vector<2x8x32xf32>
    %c0_3 = arith.constant 0 : index
    %c0_4 = arith.constant 0 : index
    %c0_5 = arith.constant 0 : index
    %4 = vector.load %arg4[%c0_3, %c0_4, %c0_5] : memref<2x1x32xf32, #tpu.memory_space<vmem>>, vector<2x1x32xf32>
    %c0_6 = arith.constant 0 : index
    %c0_7 = arith.constant 0 : index
    %c0_8 = arith.constant 0 : index
    %5 = vector.load %arg3[%c0_6, %c0_7, %c0_8] : memref<2x1x8xf32, #tpu.memory_space<vmem>>, vector<2x1x8xf32>
    %6 = vector.shape_cast %5 : vector<2x1x8xf32> to vector<2x8xf32>
    %7 = vector.broadcast %4 : vector<2x1x32xf32> to vector<2x8x32xf32>
    %8 = arith.mulf %3, %7 : vector<2x8x32xf32>
    %cst = arith.constant dense<0.000000e+00> : vector<2x8xf32>
    %9 = vector.multi_reduction <add>, %8, %cst [2] : vector<2x8x32xf32> to vector<2x8xf32>
    %cst_9 = arith.constant 0.000000e+00 : f32
    %10 = vector.broadcast %cst_9 : f32 to vector<2x8xf32>
    %11 = arith.subf %10, %6 : vector<2x8xf32>
    %12 = arith.mulf %11, %9 : vector<2x8xf32>
    %cst_10 = arith.constant 0.000000e+00 : f32
    %13 = vector.broadcast %cst_10 : f32 to vector<2x8xf32>
    %14 = arith.maximumf %12, %13 : vector<2x8xf32>
    %15 = math.absf %12 : vector<2x8xf32>
    %cst_11 = arith.constant 0.000000e+00 : f32
    %16 = vector.broadcast %cst_11 : f32 to vector<2x8xf32>
    %17 = arith.subf %16, %15 : vector<2x8xf32>
    %18 = math.exp %17 : vector<2x8xf32>
    %cst_12 = arith.constant 1.000000e+00 : f32
    %19 = vector.broadcast %cst_12 : f32 to vector<2x8xf32>
    %20 = arith.addf %19, %18 : vector<2x8xf32>
    %21 = math.log %20 : vector<2x8xf32>
    %22 = arith.addf %14, %21 : vector<2x8xf32>
    %c0_13 = arith.constant 0 : index
    %c0_14 = arith.constant 0 : index
    %c0_15 = arith.constant 0 : index
    %23 = vector.load %arg5[%c0_13, %c0_14, %c0_15] : memref<2x1x1xf32, #tpu.memory_space<vmem>>, vector<2x1x1xf32>
    %cst_16 = arith.constant dense<0.000000e+00> : vector<2xf32>
    %24 = vector.multi_reduction <add>, %22, %cst_16 [1] : vector<2x8xf32> to vector<2xf32>
    %25 = vector.shape_cast %24 : vector<2xf32> to vector<2x1xf32>
    %26 = vector.shape_cast %25 : vector<2x1xf32> to vector<2x1x1xf32>
    %27 = arith.addf %23, %26 : vector<2x1x1xf32>
    %c0_17 = arith.constant 0 : index
    %c0_18 = arith.constant 0 : index
    %c0_19 = arith.constant 0 : index
    %28 = vector.load %arg5[%c0_17, %c0_18, %c0_19] : memref<2x1x1xf32, #tpu.memory_space<vmem>>, vector<2x1x1xf32>
    tpu.vector_store %arg5[%c0_17, %c0_18, %c0_19], %27 {strides = array<i32>} : memref<2x1x1xf32, #tpu.memory_space<vmem>>, vector<2x1x1xf32>,
    %c0_i32_20 = arith.constant 0 : i32
    %29 = arith.cmpi eq, %arg1, %c0_i32_20 : i32
    %30 = arith.extui %29 : i1 to i32
    %c0_i32_21 = arith.constant 0 : i32
    %31 = arith.cmpi ne, %30, %c0_i32_21 : i32
    scf.if %31 {
      %32 = arith.mulf %4, %4 : vector<2x1x32xf32>
      %cst_22 = arith.constant dense<0.000000e+00> : vector<2x1xf32>
      %33 = vector.multi_reduction <add>, %32, %cst_22 [2] : vector<2x1x32xf32> to vector<2x1xf32>
      %34 = vector.shape_cast %33 : vector<2x1xf32> to vector<2x1x1xf32>
      %cst_23 = arith.constant 5.000000e-02 : f32
      %35 = vector.broadcast %cst_23 : f32 to vector<2x1x1xf32>
      %36 = arith.mulf %35, %34 : vector<2x1x1xf32>
      %c0_24 = arith.constant 0 : index
      %c0_25 = arith.constant 0 : index
      %c0_26 = arith.constant 0 : index
      %37 = vector.load %arg5[%c0_24, %c0_25, %c0_26] : memref<2x1x1xf32, #tpu.memory_space<vmem>>, vector<2x1x1xf32>
      %cst_27 = arith.constant 1.250000e-01 : f32
      %38 = vector.broadcast %cst_27 : f32 to vector<2x1x1xf32>
      %39 = arith.mulf %37, %38 : vector<2x1x1xf32>
      %40 = arith.addf %39, %36 : vector<2x1x1xf32>
      %c0_28 = arith.constant 0 : index
      %c0_29 = arith.constant 0 : index
      %c0_30 = arith.constant 0 : index
      %41 = vector.load %arg5[%c0_28, %c0_29, %c0_30] : memref<2x1x1xf32, #tpu.memory_space<vmem>>, vector<2x1x1xf32>
      tpu.vector_store %arg5[%c0_28, %c0_29, %c0_30], %40 {strides = array<i32>} : memref<2x1x1xf32, #tpu.memory_space<vmem>>, vector<2x1x1xf32>,
    } else {
    }
    return
  }
  func.func @transform_0(%arg0: i32, %arg1: i32) -> (i32, i32, i32) {
    %c0_i32 = arith.constant 0 : i32
    %c0_i32_0 = arith.constant 0 : i32
    return %arg0, %arg1, %c0_i32 : i32, i32, i32
  }
  func.func @transform_1(%arg0: i32, %arg1: i32) -> (i32, i32, i32) {
    %c0_i32 = arith.constant 0 : i32
    %c0_i32_0 = arith.constant 0 : i32
    return %arg0, %c0_i32, %arg1 : i32, i32, i32
  }
  func.func @transform_2(%arg0: i32, %arg1: i32) -> (i32, i32, i32) {
    %c0_i32 = arith.constant 0 : i32
    %c0_i32_0 = arith.constant 0 : i32
    %c0_i32_1 = arith.constant 0 : i32
    return %arg0, %c0_i32, %c0_i32_0 : i32, i32, i32
  }
  func.func @transform_3(%arg0: i32, %arg1: i32) -> (i32, i32, i32) {
    %c0_i32 = arith.constant 0 : i32
    %c0_i32_0 = arith.constant 0 : i32
    %c0_i32_1 = arith.constant 0 : i32
    return %arg0, %c0_i32, %c0_i32_0 : i32, i32, i32
  }
}

</mosaic_0001>

<bundles_post_ra>
// kernel: tpu_custom_call.1
= control target key start
LH: loop header
LB: loop body
LE: loop exit
PB: predicated region body
PF: predicated region fallthrough
CT: control target
= control target key end

     0   :  { %8 = vsyncpa [#allocation3], 0  ;;  %s1200_s0 = inlined_call_operand.hbm [shape: f32[4,8,32], index: 0, kind: input, shape index: {}]   ;;  %s1201_s1 = inlined_call_operand.hbm [shape: f32[4,1,8], index: 1, kind: input, shape index: {}]   ;;  %s1202_s2 = inlined_call_operand.vmem [shape: f32[4,1,32], index: 2, kind: input, shape index: {}]   ;;  %s1203_s3 = inlined_call_operand.vmem [shape: f32[4,1,1], index: 3, kind: output, shape index: {}]  }
   0x1   :  { %10 = vsyncpa [#allocation3 + $0x1], 0 }
   0x2   :  { %11 = vsyncpa [#allocation5], 0 }
   0x3   :  { %13 = vsyncpa [#allocation5 + $0x1], 0  ;;  %s944_s12 = smov 0   ;;  %s946_s13 = smov 0  }
   0x4   :  { %s948_s14 = smov 0   ;;  %s950_s15 = smov 0  }
   0x5   :  { %s952_s16 = smov 0   ;;  %s954_s17 = smov 0  }
   0x6 LB: > { %s703_s18 = sadd.s32 4294967295, %s913_s17   ;;  %s31_s19 = sadd.s32 1, %s909_s16  ;;  %s913_s17 = sphi %s954_s17, %s19_s17   ;;  %s909_s16 = sphi %s952_s16, %s1214_s16   ;;  %s905_s15 = sphi %s950_s15, %s1213_s15   ;;  %s901_s14 = sphi %s948_s14, %s1212_s14   ;;  %s897_s13 = sphi %s946_s13, %s1211_s13   ;;  %s893_s12 = sphi %s944_s12, %s1210_s12  }
   0x7   : > { %p33_p0 = scmp.ge.s32.totalorder %s31_s19, 2  ;;  %s40_s20 = sadd.s32 1, %s901_s14 }
   0x8   : > { %p47_p1 = scmp.ne.s32.totalorder %s901_s14, %s897_s13  ;;  %p48_p2 = scmp.eq.s32.totalorder %s913_s17, 0 }
   0x9   : > { %s1216_s19 = smov (%p33_p0, %s31_s19), 0  ;;  %p53_p4 = scmp.ne.s32.totalorder %s897_s13, %s893_s12 }
   0xa   : > { %p980_p3 = por %p48_p2, %p47_p1  ;;  %s35_s22 = ssub.s32 %s909_s16, %s1216_s19 }
   0xb   : > { %p54_p5 = scmp.eq.s32.totalorder %s703_s18, 0  ;;  %p38_p6 = scmp.eq.s32.totalorder %s35_s22, 0 }
   0xc   : > { %p733_p8 = scmp.lt.s32.totalorder %s913_s17, 2  ;;  %s996_s25 = sand.u32 1, %s901_s14  }
   0xd   : > { %p987_p7 = por %p54_p5, %p53_p4  ;;  %s720_s26 = sshll.u32 %s909_s16, 8 }
   0xe   : > { %s993_s24 = scalar_select %p38_p6, %s901_s14, %s40_s20  }
   0xf   : > { %s1206_s23 = scalar_select %p987_p7, 1, 0 }
  0x10   : > { %s707_s27 = sshll.u32 %s996_s25, 4  ;;  %s1003_s30 = scalar_lea.hbm %s1200_s0, %s720_s26 }
  0x11   : > { %s161_s4 = scalar_lea.vmem [#allocation2], %s707_s27  ;;  %p1007_p9 = pnand %p733_p8, %p980_p3 }
  0x12   : > { %s169_s5 = sshll.u32 %s161_s4, 4  ;;  %s158_s7 = scalar_lea.sflag [#allocation3], %s996_s25  ;;  %s1011_s5 = int_to_ptr.vmem [resolvable:$true] %s169_s5 }
  0x13   : > { %s799_s8 = scalar_lea.hbm %s1003_s30, 256  ;;  %p801_p11 = pneg %p1007_p9 }
  0x14   : > { %p800_p10 = scmp.ne.s32.totalorder %s1003_s30, %s799_s8  ;;  %s804_s11 = scalar_lea.hbm %s1200_s0, 512 }
  0x15   : > { %p805_p0 = scmp.lt.u32.totalorder %s1003_s30, %s1200_s0  ;;  %p806_p1 = scmp.lt.u32.totalorder %s804_s11, %s799_s8 }
  0x16   : > { %p802_p12 = pnand %p801_p11, %p800_p10  ;;  %p808_p3 = scmp.lt.u32.totalorder %s799_s8, %s1003_s30 }
  0x17   : > { %p807_p2 = por %p806_p1, %p805_p0 }
  0x18   : > { %p803_p13 = pneg %p802_p12 }
  0x19   : > { %p809_p4 = por %p808_p3, %p807_p2 }
  0x1b   : > { %p810_p5 = pnand %p809_p4, %p803_p13 }
  0x1d   : > { %813 = shalt.err (!%p810_p5)
}
  0x1e   : > { %s814_s20 = scalar_lea.vmem %s1011_s5, 256  ;;  %s915_s21 = smov [#allocation2]  }
  0x1f   : > { %p815_p6 = scmp.ne.s32.totalorder %s1011_s5, %s814_s20  ;;  %s819_s22 = sshll.u32 %s915_s21, 4  ;;  %s820_s22 = int_to_ptr.vmem [resolvable:$false] %s819_s22 }
  0x20   : > { %s821_s26 = scalar_lea.vmem %s820_s22, 512  ;;  %p822_p12 = scmp.lt.s32.totalorder %s1011_s5, %s820_s22 }
  0x21   : > { %p817_p8 = pnand %p815_p6, %p801_p11  ;;  %p823_p0 = scmp.lt.s32.totalorder %s821_s26, %s814_s20 }
  0x23   : > { %p818_p10 = pneg %p817_p8  ;;  %p824_p1 = por %p823_p0, %p822_p12 }
  0x25   : > { %p825_p2 = pnand %p824_p1, %p818_p10 }
  0x27   : > { %828 = shalt.err (!%p825_p2)
}
  0x28   : > { %s916_s27 = smov 128   ;;  %s917_s28 = smov 8  }
  0x29   : > { %729 = dma.hbm_to_vmem [thread:$0]  (!%p1007_p9), %s1003_s30, 256, %s1011_s5, %s158_s7, %s916_s27, %s916_s27, %s917_s28  }
  0x2a   : > { %p713_p13 = scmp.ge.s32.totalorder %s913_s17, 1  ;;  %p207_p3 = scmp.lt.s32.totalorder %s913_s17, 3 }
  0x2b   : > { %s710_s29 = sshll.u32 %s996_s25, 1  ;;  %s721_s8 = sshll.u32 %s909_s16, 5 }
  0x2c   : > { %p1044_p4 = pnand %p713_p13, %p207_p3  ;;  %s183_s9 = scalar_lea.vmem [#allocation4], %s710_s29 }
  0x2d   : > { %s191_s10 = sshll.u32 %s183_s9, 4  ;;  %s1052_s18 = scalar_lea.hbm %s1201_s1, %s721_s8  ;;  %s1054_s10 = int_to_ptr.vmem [resolvable:$true] %s191_s10 }
  0x2e   : > { %s180_s30 = scalar_lea.sflag [#allocation5], %s996_s25  ;;  %s829_s5 = scalar_lea.hbm %s1052_s18, 32 }
  0x2f   : > { %p830_p5 = scmp.ne.s32.totalorder %s1052_s18, %s829_s5  ;;  %s834_s21 = scalar_lea.hbm %s1201_s1, 64 }
  0x30   : > { %p835_p10 = scmp.lt.u32.totalorder %s1052_s18, %s1201_s1  ;;  %p836_p12 = scmp.lt.u32.totalorder %s834_s21, %s829_s5 }
  0x31   : > { %p832_p6 = pnand %p830_p5, %p801_p11  ;;  %p838_p1 = scmp.lt.u32.totalorder %s829_s5, %s1052_s18 }
  0x32   : > { %p837_p0 = por %p836_p12, %p835_p10 }
  0x33   : > { %p833_p8 = pneg %p832_p6 }
  0x34   : > { %p839_p2 = por %p838_p1, %p837_p0 }
  0x36   : > { %p840_p13 = pnand %p839_p2, %p833_p8 }
  0x38   : > { %843 = shalt.err (!%p840_p13)
}
  0x39   : > { %s844_s27 = scalar_lea.vmem %s1054_s10, 32  ;;  %s918_s28 = smov [#allocation4]  }
  0x3a   : > { %p845_p3 = scmp.ne.s32.totalorder %s1054_s10, %s844_s27  ;;  %s849_s29 = sshll.u32 %s918_s28, 4  ;;  %s850_s29 = int_to_ptr.vmem [resolvable:$false] %s849_s29 }
  0x3b   : > { %s851_s8 = scalar_lea.vmem %s850_s29, 64  ;;  %p852_p7 = scmp.lt.s32.totalorder %s1054_s10, %s850_s29 }
  0x3c   : > { %p847_p5 = pnand %p845_p3, %p801_p11  ;;  %p853_p10 = scmp.lt.s32.totalorder %s851_s8, %s844_s27 }
  0x3e   : > { %p848_p6 = pneg %p847_p5  ;;  %p854_p12 = por %p853_p10, %p852_p7 }
  0x40   : > { %p855_p0 = pnand %p854_p12, %p848_p6 }
  0x42   : > { %858 = shalt.err (!%p855_p0)
}
  0x43   : > { %s919_s9 = smov 16   ;;  %s920_s11 = smov 1  }
  0x44   : > { %732 = dma.hbm_to_vmem [thread:$0]  (!%p1007_p9), %s1052_s18, 32, %s1054_s10, %s180_s30, %s919_s9, %s919_s9, %s920_s11  }
  0x45   : > { %211 = sbr.rel (%p1044_p4) target bundleno = 588 (0x24c), region = 32  ;;  %s213_s12 = sand.u32 (!%p1044_p4), 1, %s897_s13  }
  0x46   : > { %s714_s5 = sshll.u32 (!%p1044_p4), %s213_s12, 4  ;;  %s214_s7 = scalar_lea.sflag (!%p1044_p4), [#allocation3], %s213_s12 }
  0x47   : > { %s217_s20 = scalar_lea.vmem (!%p1044_p4), [#allocation2], %s714_s5  ;;  %p1209_p7 = scmp.ne.s32.totalorder (!%p1044_p4), %s1206_s23, 0 }
  0x4c   : > { %884 = dma.done.wait (%p1209_p7), %s214_s7, 256  }
  0x4d   : > { %886 = vsyncadd (%p1209_p7), %s214_s7, 4294967040  ;;  %s715_s21 = sshll.u32 %s213_s12, 1  ;;  %s223_s22 = scalar_lea.sflag [#allocation5], %s213_s12 }
  0x4e   : > { %s1089_s6 = scalar_lea.vmem [#allocation4], %s715_s21 }
  0x4f   : > { %888 = dma.done.wait (%p1209_p7), %s223_s22, 32  }
  0x50   : > { %890 = vsyncadd (%p1209_p7), %s223_s22, 4294967264  ;;  %s716_s25 = sshll.u32 %s905_s15, 1  ;;  %v284_v0 = vlaneseq  ;;  %vm273_vm0 = vcmask 0   ;;  %v921_v3 = vmov 0.0   ;;  %v276_v4 = vld [vmem:[%s217_s20] sm:$0xff]  ;;  %v277_v7 = vld [vmem:[%s217_s20 + $0x8] sm:$0xff] }
  0x51   : > { %p260_p9 = scmp.lt.s32.totalorder %s716_s25, 3  ;;  %vm296_vm1 = vcmask 261120   ;;  %v922_v14 = vmov 0   ;;  %v923_v17 = vmov 1966171168   ;;  %vm580_vm2 = vcmask 253952  }
  0x52   : > { %v1096_v1 = vshrl.u32 %v284_v0, 7  ;;  %789 = vset.pattern.permute.xlu1 %v922_v14  ;;  %790 = vset.pattern.permute.xlu0 %v922_v14  ;;  %v476_v15 = vand.u32 127, %v284_v0  ;;  %v376_v18 = vunpack.c.l.s4 %v923_v17  ;;  %vm555_vm3 = vcmask 58368  }
  0x53   : > { %s1218_s25 = smov (!%p260_p9, %s716_s25), 3 }
  0x54   : > { %v1099_v2 = vsub.s32 0, %v1096_v1  ;;  %s262_s18 = scalar_lea.vmem %s1202_s2, %s1218_s25  ;;  %s1107_s23 = scalar_lea.vmem %s1203_s3, %s1218_s25  ;;  %v1122_v16 = vsub.s32 %v476_v15, %v1096_v1  ;;  %v377_v19 = vunpack.c.0.s8 %v376_v18  ;;  %v1125_v20 = vsub.s32 1, %v1096_v1 }
  0x55   : > { %274 = vst.msk [vmem:[%s1107_s23] sm:$0x1] %vm273_vm0, %v921_v3  ;;  %v1111_v5 = vld [vmem:[%s262_s18] sm:$0x1]  ;;  %275 = vst.msk [vmem:[%s1107_s23 + $0x1] sm:$0x1] %vm273_vm0, %v921_v3 }
  0x56   : > { %v287_v6 = vrot.slane %v1111_v5, %v1099_v2  ;;  %v1117_v8 = vld [vmem:[%s262_s18 + $0x1] sm:$0x1]  ;;  %v317_v21 = vsub.s32 2, %v1096_v1  ;;  %v321_v22 = vsub.s32 3, %v1096_v1  ;;  %v325_v23 = vsub.s32 4, %v1096_v1 }
  0x57   : > { %v291_v9 = vrot.slane %v1117_v8, %v1099_v2  ;;  %v329_v24 = vsub.s32 5, %v1096_v1  ;;  %v333_v25 = vsub.s32 6, %v1096_v1  ;;  %v337_v26 = vsub.s32 7, %v1096_v1 }
  0x58   : > { %v294_v10 = vmul.f32 %v287_v6, %v276_v4  ;;  %v1134_v27 = vsub.s32 %v377_v19, %v1096_v1 }
  0x59   : > { %v295_v11 = vmul.f32 %v291_v9, %v277_v7 }
  0x5a   : > { %v297_v12 = vsel %vm296_vm1, %v294_v10, 0.0 }
  0x5b   : > { %298 = vadd.xlane.f32.xlu0 %v297_v12  ;;  %v300_v13 = vsel %vm296_vm1, %v295_v11, 0.0  ;;  %v578_v11 = vmul.f32 %v1111_v5, %v1111_v5 }
  0x5d   : > { %v581_v12 = vsel %vm580_vm2, %v578_v11, 0.0 }
  0x5f   : > { %301 = vadd.xlane.f32.xlu0 %v300_v13  ;;  %v280_v13 = vld [vmem:[%s1089_s6] sm:$0x1] }
  0x60   : > { %v303_v17 = vsub.f32 0.0, %v280_v13 }
  0xe8   : > { %v299_v28 = vpop.xlane.xlu0 %298 }
  0xe9   : > { %v310_v29 = vrot.slane %v299_v28, %v1099_v2  ;;  %v314_v30 = vrot.slane %v299_v28, %v1125_v20  ;;  %v318_v31 = vrot.slane %v299_v28, %v317_v21  ;;  %v322_v32 = vrot.slane %v299_v28, %v321_v22 }
  0xea   : > { %v326_v33 = vrot.slane %v299_v28, %v325_v23  ;;  %v330_v34 = vrot.slane %v299_v28, %v329_v24  ;;  %v334_v35 = vrot.slane %v299_v28, %v333_v25  ;;  %v338_v36 = vrot.slane %v299_v28, %v337_v26 }
  0xeb   : > { %v371_v37 = vcombine.low %v310_v29, %v314_v30  ;;  %v372_v38 = vcombine.low %v318_v31, %v322_v32 }
  0xec   : > { %v302_v39 = vpop.xlane.xlu0 %301  ;;  %v373_v40 = vcombine.low %v326_v33, %v330_v34  ;;  %v374_v41 = vcombine.low %v334_v35, %v338_v36 }
  0xed   : > { %v381_v42 = vrot.slane %v371_v37, %v1134_v27  ;;  %v388_v43 = vrot.slane %v372_v38, %v1134_v27  ;;  %v342_v44 = vrot.slane %v302_v39, %v1099_v2  ;;  %v346_v45 = vrot.slane %v302_v39, %v1125_v20 }
  0xee   : > { %v395_v46 = vrot.slane %v373_v40, %v1134_v27  ;;  %v402_v47 = vrot.slane %v374_v41, %v1134_v27  ;;  %v350_v48 = vrot.slane %v302_v39, %v317_v21  ;;  %v354_v49 = vrot.slane %v302_v39, %v321_v22  ;;  %v281_v21 = vld [vmem:[%s1089_s6 + $0x1] sm:$0x1] }
  0xef   : > { %v403_v50 = vcombine.low %v381_v42, %v388_v43  ;;  %v358_v51 = vrot.slane %v302_v39, %v325_v23  ;;  %v362_v52 = vrot.slane %v302_v39, %v329_v24  ;;  %v366_v53 = vrot.slane %v302_v39, %v333_v25 }
  0xf0   : > { %v404_v54 = vcombine.low %v395_v46, %v402_v47  ;;  %v370_v55 = vrot.slane %v302_v39, %v337_v26  ;;  %v420_v56 = vcombine.low %v342_v44, %v346_v45  ;;  %v421_v57 = vcombine.low %v350_v48, %v354_v49 }
  0xf1   : > { %v411_v58 = vrot.slane %v403_v50, %v1134_v27  ;;  %v422_v59 = vcombine.low %v358_v51, %v362_v52  ;;  %v304_v5 = vsub.f32 0.0, %v281_v21  ;;  %v579_v49 = vmul.f32 %v1117_v8, %v1117_v8 }
  0xf2   : > { %v418_v60 = vrot.slane %v404_v54, %v1134_v27  ;;  %v423_v61 = vcombine.low %v366_v53, %v370_v55  ;;  %v430_v62 = vrot.slane %v420_v56, %v1134_v27  ;;  %v437_v63 = vrot.slane %v421_v57, %v1134_v27  ;;  %v535_v53 = vld [vmem:[%s1107_s23] sm:$0x1]  ;;  %v536_v54 = vld [vmem:[%s1107_s23 + $0x1] sm:$0x1] }
  0xf3   : > { %v444_v0 = vrot.slane %v422_v59, %v1134_v27  ;;  %v584_v51 = vsel %vm580_vm2, %v579_v49, 0.0 }
  0xf4   : > { %v419_v1 = vcombine.low %v411_v58, %v418_v60  ;;  %v451_v3 = vrot.slane %v423_v61, %v1134_v27  ;;  %v452_v4 = vcombine.low %v430_v62, %v437_v63 }
  0xf6   : > { %470 = vperm.xlu1 %789, %v419_v1   ;;  %v453_v6 = vcombine.low %v444_v0, %v451_v3  ;;  %v460_v7 = vrot.slane %v452_v4, %v1134_v27 }
  0xf8   : > { %v467_v9 = vrot.slane %v453_v6, %v1134_v27 }
  0xfa   : > { %v468_v10 = vcombine.low %v460_v7, %v467_v9 }
  0xfc   : > { %473 = vperm.xlu1 %789, %v468_v10  }
 0x120   : > { %582 = vadd.xlane.f32.xlu1 %v581_v12 }
 0x175   : > { %v471_v14 = vpop.permute.xlu1 %470 }
 0x176   : > { %v480_v15 = vrot.slane %v471_v14, %v1122_v16 }
 0x178   : > { %v491_v18 = vrot.slane %v480_v15, %v1134_v27 }
 0x17a   : > { %v498_v19 = vrot.slane %v491_v18, %v1134_v27 }
 0x17b   : > { %v474_v22 = vpop.permute.xlu1 %473 }
 0x17c   : > { %v515_v23 = vmul.f32 %v498_v19, %v303_v17  ;;  %v484_v24 = vrot.slane %v474_v22, %v1122_v16 }
 0x17e   : > { %v519_v25 = vand.u32 2147483647, %v515_v23  ;;  %v505_v26 = vrot.slane %v484_v24, %v1134_v27  ;;  %v517_v41 = vmax.f32 %v515_v23, 0.0 }
 0x180   : > { %v521_v28 = vsub.f32 0.0, %v519_v25  ;;  %v512_v29 = vrot.slane %v505_v26, %v1134_v27 }
 0x182   : > { %v523_v30 = vmul.f32 1.442695, %v521_v28  ;;  %v516_v31 = vmul.f32 %v512_v29, %v304_v5 }
 0x184   : > { %791 = vpow2.f32 %v523_v30  ;;  %v520_v32 = vand.u32 2147483647, %v516_v31  ;;  %v518_v42 = vmax.f32 %v516_v31, 0.0 }
 0x186   : > { %v522_v33 = vsub.f32 0.0, %v520_v32 }
 0x188   : > { %v525_v34 = vmul.f32 1.442695, %v522_v33 }
 0x18a   : > { %793 = vpow2.f32 %v525_v34 }
 0x18e   : > { %v792_v35 = vpop.eup %791 }
 0x18f   : > { %v527_v36 = vadd.f32 1.0, %v792_v35 }
 0x191   : > { %795 = vlog2.f32 %v527_v36 }
 0x194   : > { %v794_v37 = vpop.eup %793 }
 0x195   : > { %v528_v38 = vadd.f32 1.0, %v794_v37 }
 0x197   : > { %797 = vlog2.f32 %v528_v38 }
 0x19b   : > { %v796_v16 = vpop.eup %795 }
 0x19c   : > { %v530_v39 = vmul.f32 0.6931472, %v796_v16 }
 0x19e   : > { %v533_v44 = vadd.f32 %v530_v39, %v517_v41 }
 0x1a1   : > { %v798_v40 = vpop.eup %797 }
 0x1a2   : > { %v532_v43 = vmul.f32 0.6931472, %v798_v40 }
 0x1a4   : > { %v534_v45 = vadd.f32 %v532_v43, %v518_v42 }
 0x1a6   : > { %v539_v46 = vcombine.low %v533_v44, %v534_v45 }
 0x1a8   : > { %v546_v47 = vrot.slane %v539_v46, %v1134_v27 }
 0x1aa   : > { %v553_v48 = vrot.slane %v546_v47, %v1134_v27 }
 0x1ac   : > { %v556_v50 = vsel %vm555_vm3, %v553_v48, 0.0 }
 0x1ad   : > { %557 = vadd.xlane.f32.xlu0 %v556_v50  ;;  %v583_v58 = vpop.xlane.xlu1 %582 }
 0x1ae   : > { %v587_v60 = vmul.f32 0.05, %v583_v58 }
 0x1b1   : > { %585 = vadd.xlane.f32.xlu0 %v584_v51 }
 0x23a   : > { %v558_v52 = vpop.xlane.xlu0 %557 }
 0x23b   : > { %v563_v55 = vrot.slane %v558_v52, %v1099_v2  ;;  %v567_v56 = vrot.slane %v558_v52, %v1125_v20 }
 0x23d   : > { %v570_v27 = vadd.f32 %v563_v55, %v535_v53  ;;  %v571_v57 = vadd.f32 %v567_v56, %v536_v54 }
 0x23e   : > { %v586_v8 = vpop.xlane.xlu0 %585 }
 0x23f   : > { %573 = vst.msk [vmem:[%s1107_s23] sm:$0x1] %vm273_vm0, %v570_v27  ;;  %574 = vst.msk [vmem:[%s1107_s23 + $0x1] sm:$0x1] %vm273_vm0, %v571_v57  ;;  %v588_v59 = vmul.f32 0.05, %v586_v8 }
 0x246   : > { %v590_v61 = vld [vmem:[%s1107_s23 + $0x1] sm:$0x1]  ;;  %v589_v62 = vld [vmem:[%s1107_s23] sm:$0x1] }
 0x247   : > { %v592_v63 = vmul.f32 0.125, %v590_v61  ;;  %v591_v0 = vmul.f32 0.125, %v589_v62 }
 0x249   : > { %v594_v1 = vadd.f32 %v592_v63, %v588_v59  ;;  %v593_v2 = vadd.f32 %v591_v0, %v587_v60 }
 0x24b   : > { %595 = vst.msk [vmem:[%s1107_s23] sm:$0x1] %vm273_vm0, %v593_v2  ;;  %596 = vst.msk [vmem:[%s1107_s23 + $0x1] sm:$0x1] %vm273_vm0, %v594_v1 }
 0x24c PF: > { %s19_s17 = sadd.s32 1, %s913_s17   ;;  %s1210_s12 = smov %s897_s13 }
 0x24d   : > { %p16_p11 = scmp.ge.s32.totalorder %s19_s17, 4   ;;  %s1211_s13 = smov %s901_s14 }
 0x24e   : > { %s1212_s14 = smov %s993_s24  ;;  %s1213_s15 = smov %s909_s16 }
 0x24f   : > { %s1214_s16 = smov %s1216_s19  ;;  %18 = sbr.rel (!%p16_p11) target bundleno = 6 (0x6), region = 96 }
 0x256   :  { %617 = vsyncpa [#allocation3], 1 }
 0x257   :  { %619 = vsyncpa [#allocation3 + $0x1], 1 }
 0x258   :  { %620 = vsyncpa [#allocation5], 1 }
 0x259   :  { %622 = vsyncpa [#allocation5 + $0x1], 1 }

</bundles_post_ra>
